<compile_context>
chip_gen: v5e
topology: v5e:2x2
jax: 0.10.0
libtpu: 0.0.40
codegen_flags: <defaults>
</compile_context>

<pallas_src>
import functools

import jax
import jax.numpy as jnp
from jax.experimental import pallas as pl
from jax.experimental.pallas import tpu as pltpu

MIB = 1 << 20


# ----------------------------------------------------------------------------- kernels
def _affine_store(o_ref, y, gamma_ref, beta_ref):
    """Epilogue: gamma * y + beta, in bf16 when the output is bf16."""
    if o_ref.dtype == jnp.bfloat16:
        o_ref[...] = (gamma_ref[...].astype(jnp.bfloat16) * y.astype(jnp.bfloat16)
                      + beta_ref[...].astype(jnp.bfloat16))
    else:
        o_ref[...] = (gamma_ref[...].astype(jnp.float32) * y
                      + beta_ref[...].astype(jnp.float32)).astype(o_ref.dtype)


def _rowwise_layernorm_kernel(x_ref, gamma_ref, beta_ref, o_ref, *, eps):
    x = x_ref[...].astype(jnp.float32)               # (tm, H)
    u = jnp.mean(x, axis=-1, keepdims=True)          # biased mean
    xc = x - u
    s = jnp.mean(xc * xc, axis=-1, keepdims=True)    # biased variance
    y = xc * jax.lax.rsqrt(s + eps)                  # eps inside the sqrt
    _affine_store(o_ref, y, gamma_ref, beta_ref)


def _grouped_layernorm_kernel(x_ref, gamma_ref, beta_ref, seg_ref, o_ref, *,
                              hidden, eps):
    # Block packs `group = width // hidden` original rows along the lane axis
    # (width == 128 when hidden < 128), keeping loads/stores lane-dense.
    # Segment sums run on the (otherwise idle) MXU against a resident
    # block-diagonal 0/1 matrix, which also broadcasts the statistic back.
    x = x_ref[...].astype(jnp.float32)               # (tm, width)
    seg = seg_ref[...]                               # (width, width), resident
    inv_h = 1.0 / float(hidden)

    u = jnp.dot(x, seg, preferred_element_type=jnp.float32,
                precision=jax.lax.Precision.HIGHEST) * inv_h
    xc = x - u
    s = jnp.dot(xc * xc, seg, preferred_element_type=jnp.float32,
                precision=jax.lax.Precision.HIGHEST) * inv_h
    y = xc * jax.lax.rsqrt(s + eps)
    _affine_store(o_ref, y, gamma_ref, beta_ref)


# ----------------------------------------------------------------------------- tiling
def _vmem_capacity_bytes():
    try:
        return int(pltpu.get_tpu_info().vmem_capacity_bytes)
    except Exception:
        return 64 * MIB                 # conservative (v7x per-TC size)


def _vmem_budgets():
    """(tile_budget_bytes, vmem_limit_cap_bytes) by VMEM generation."""
    cap = _vmem_capacity_bytes()
    if cap <= 64 * MIB:                 # v7x-class: 64 MiB per TensorCore
        return 16 * MIB, 48 * MIB
    return cap // 2, int(cap * 0.85)    # v5e/v6e: 128 MiB physical


def _choose_row_tile(rows, width, in_bytes, out_bytes, tile_budget, sublane):
    """Row tile sized by bytes (double-buffered in/out + f32 temporaries),
    targeting >= ~4 MiB per input buffer, rounded to the dtype's sublane
    packing, and never collapsing to a single grid step when rows allow
    (so both v7x TensorCores get work and DMAs double-buffer)."""
    per_row = width * (2 * in_bytes + 2 * out_bytes + 6 * 4)
    cap = max(sublane, tile_budget // per_row)
    target = max(sublane, (4 * MIB) // (width * in_bytes))
    tm = min(cap, target)
    half = (rows + 1) // 2
    if half >= sublane:
        tm = min(tm, half)              # keep >= 2 grid steps
    rows_rounded = ((rows + sublane - 1) // sublane) * sublane
    tm = min(tm, rows_rounded)          # never exceed the (rounded) row count
    tm = max(sublane, (tm // sublane) * sublane)
    return tm


# ----------------------------------------------------------------------------- wrapper
def trans_layer_norm(x, gamma, beta, eps=1e-12):
    """LayerNorm over the last axis, matching TransLayerNorm.forward exactly."""
    orig_shape = x.shape
    hidden = orig_shape[-1]
    n_rows = 1
    for d in orig_shape[:-1]:
        n_rows *= int(d)
    x2 = x.reshape(n_rows, hidden)

    tile_budget, vmem_limit_cap = _vmem_budgets()

    # Lane-dense grouped path whenever hidden is narrower than a vreg lane row.
    group = 1
    if hidden < 128 and 128 % hidden == 0:
        group = 128 // hidden

    pad_rows = 0
    if group > 1:
        if n_rows % group != 0:
            # Tiny pad (<= group-1 rows) so we never fall back to a
            # sub-128-lane (masked partial-store) layout.
            pad_rows = group - (n_rows % group)
            x2 = jnp.pad(x2, ((0, pad_rows), (0, 0)))
        rows = (n_rows + pad_rows) // group
        width = group * hidden
        xk = x2.reshape(rows, width)
        gamma_k = jnp.tile(gamma.reshape(1, hidden), (1, group))
        beta_k = jnp.tile(beta.reshape(1, hidden), (1, group))
        # Block-diagonal segment-sum matrix, built once on the host side and
        # kept resident in VMEM via a constant index_map.
        seg_row = jax.lax.broadcasted_iota(jnp.int32, (width, width), 0) // hidden
        seg_col = jax.lax.broadcasted_iota(jnp.int32, (width, width), 1) // hidden
        seg = (seg_row == seg_col).astype(jnp.float32)
        kernel = functools.partial(_grouped_layernorm_kernel, hidden=hidden, eps=eps)
        extra_inputs = (seg,)
        extra_specs = [pl.BlockSpec((width, width), lambda i: (0, 0))]
    else:
        rows = n_rows
        width = hidden
        xk = x2
        gamma_k = gamma.reshape(1, hidden)
        beta_k = beta.reshape(1, hidden)
        kernel = functools.partial(_rowwise_layernorm_kernel, eps=eps)
        extra_inputs = ()
        extra_specs = []

    in_bytes = xk.dtype.itemsize
    out_bytes = in_bytes
    sublane = max(8, 32 // in_bytes)     # 8 f32 / 16 bf16 / 32 int8
    tm = _choose_row_tile(rows, width, in_bytes, out_bytes, tile_budget, sublane)

    # Ragged row counts: no host-side pad/slice round trip.  Rows are fully
    # independent, so the partial last block is safe (OOB writes are dropped).
    grid = (pl.cdiv(rows, tm),)

    tile_bytes = tm * width * (2 * in_bytes + 2 * out_bytes + 6 * 4)
    vmem_limit = min(max(32 * MIB, tile_bytes + 8 * MIB), vmem_limit_cap)

    flops = 10 * rows * width
    if group > 1:
        flops += 4 * rows * width * width      # segment-sum matmuls
    cost = pl.CostEstimate(
        flops=flops,
        transcendentals=rows * (width // hidden),
        bytes_accessed=(2 * rows * width + 2 * width) * in_bytes,
    )

    out = pl.pallas_call(
        kernel,
        out_shape=jax.ShapeDtypeStruct((rows, width), x.dtype),
        grid_spec=pltpu.PrefetchScalarGridSpec(
            num_scalar_prefetch=0,
            grid=grid,
            in_specs=[
                pl.BlockSpec((tm, width), lambda i: (i, 0)),
                pl.BlockSpec((1, width), lambda i: (0, 0)),
                pl.BlockSpec((1, width), lambda i: (0, 0)),
            ] + extra_specs,
            out_specs=pl.BlockSpec((tm, width), lambda i: (i, 0)),
        ),
        compiler_params=pltpu.CompilerParams(
            dimension_semantics=("parallel",),
            vmem_limit_bytes=int(vmem_limit),
        ),
        cost_estimate=cost,
    )(xk, gamma_k, beta_k, *extra_inputs)

    if group > 1:
        out = out.reshape(rows * group, hidden)
        if pad_rows:
            out = out[:n_rows]
    return out.reshape(orig_shape)


# ----------------------------------------------------------------------------- demo
def _reference(x, gamma, beta, eps):
    u = jnp.mean(x, axis=-1, keepdims=True)
    s = jnp.mean((x - u) ** 2, axis=-1, keepdims=True)
    return gamma * ((x - u) / jnp.sqrt(s + eps)) + beta


if __name__ == "__main__":
    key = jax.random.PRNGKey(0)
    eps = 1e-12

    # 1) toy shape from the module spec (hidden=32 -> lane-dense grouped path)
    batch, seq, hidden = 2, 8, 32
    gamma = jnp.ones((hidden,), dtype=jnp.float32)   # nn.Parameter(ones)
    beta = jnp.zeros((hidden,), dtype=jnp.float32)   # nn.Parameter(zeros)
    k1, k2 = jax.random.split(key)
    x = jax.random.normal(k1, (batch, seq, hidden), dtype=jnp.float32)

    y = jax.block_until_ready(trans_layer_norm(x, gamma, beta, eps=eps))
    ref = _reference(x, gamma, beta, eps)
    assert jnp.allclose(y, ref, atol=1e-5, rtol=1e-5), "mismatch (grouped path)"

    # 2) wide hidden (multiple of 128 -> row-wise path)
    hidden2 = 128
    gamma2 = jnp.ones((hidden2,), dtype=jnp.float32)
    beta2 = jnp.zeros((hidden2,), dtype=jnp.float32)
    x2 = jax.random.normal(k2, (batch, seq, hidden2), dtype=jnp.float32)

    y2 = jax.block_until_ready(trans_layer_norm(x2, gamma2, beta2, eps=eps))
    ref2 = _reference(x2, gamma2, beta2, eps)
    assert jnp.allclose(y2, ref2, atol=1e-5, rtol=1e-5), "mismatch (row-wise path)"

    print("KERNEL_OK")
</pallas_src>

<mosaic_0001>
module attributes {stable_mosaic.version = 11 : i64} {
  func.func @_grouped_layernorm_kernel(%arg0: i32, %arg1: memref<8x128xf32, #tpu.memory_space<vmem>>, %arg2: memref<1x128xf32, #tpu.memory_space<vmem>>, %arg3: memref<1x128xf32, #tpu.memory_space<vmem>>, %arg4: memref<128x128xf32, #tpu.memory_space<vmem>>, %arg5: memref<8x128xf32, #tpu.memory_space<vmem>>) attributes {dimension_semantics = [#tpu.dimension_semantics<parallel>], iteration_bounds = array<i64: 1>, scalar_prefetch = 0 : i64, scratch_operands = 0 : i64, tpu.core_type = #tpu.core_type<tc>, window_params = [{transform_indices = @transform_0, window_bounds = array<i64: 8, 128>}, {pipeline_mode = #tpu.pipeline_mode<synchronous>, transform_indices = @transform_1, window_bounds = array<i64: 1, 128>}, {pipeline_mode = #tpu.pipeline_mode<synchronous>, transform_indices = @transform_2, window_bounds = array<i64: 1, 128>}, {pipeline_mode = #tpu.pipeline_mode<synchronous>, transform_indices = @transform_3, window_bounds = array<i64: 128, 128>}, {transform_indices = @transform_4, window_bounds = array<i64: 8, 128>}]} {
    %c0 = arith.constant 0 : index
    %c0_0 = arith.constant 0 : index
    %0 = vector.load %arg1[%c0, %c0_0] : memref<8x128xf32, #tpu.memory_space<vmem>>, vector<8x128xf32>
    %c0_1 = arith.constant 0 : index
    %c0_2 = arith.constant 0 : index
    %1 = vector.load %arg4[%c0_1, %c0_2] : memref<128x128xf32, #tpu.memory_space<vmem>>, vector<128x128xf32>
    %cst = arith.constant dense<0.000000e+00> : vector<8x128xf32>
    %2 = tpu.matmul %0, %1, %cst {dimension_numbers = #tpu.dot_dimension_numbers<[1], [0], [0], [1], [0, 0, 1, 1], [], []>, precision = #tpu.contract_precision<fp32>} : vector<8x128xf32>, vector<128x128xf32>, vector<8x128xf32> -> vector<8x128xf32>
    %cst_3 = arith.constant 3.125000e-02 : f32
    %3 = vector.broadcast %cst_3 : f32 to vector<8x128xf32>
    %4 = arith.mulf %2, %3 : vector<8x128xf32>
    %5 = arith.subf %0, %4 : vector<8x128xf32>
    %6 = arith.mulf %5, %5 : vector<8x128xf32>
    %cst_4 = arith.constant dense<0.000000e+00> : vector<8x128xf32>
    %7 = tpu.matmul %6, %1, %cst_4 {dimension_numbers = #tpu.dot_dimension_numbers<[1], [0], [0], [1], [0, 0, 1, 1], [], []>, precision = #tpu.contract_precision<fp32>} : vector<8x128xf32>, vector<128x128xf32>, vector<8x128xf32> -> vector<8x128xf32>
    %cst_5 = arith.constant 3.125000e-02 : f32
    %8 = vector.broadcast %cst_5 : f32 to vector<8x128xf32>
    %9 = arith.mulf %7, %8 : vector<8x128xf32>
    %cst_6 = arith.constant 9.99999996E-13 : f32
    %10 = vector.broadcast %cst_6 : f32 to vector<8x128xf32>
    %11 = arith.addf %9, %10 : vector<8x128xf32>
    %12 = math.rsqrt %11 : vector<8x128xf32>
    %13 = arith.mulf %5, %12 : vector<8x128xf32>
    %c0_7 = arith.constant 0 : index
    %c0_8 = arith.constant 0 : index
    %14 = vector.load %arg2[%c0_7, %c0_8] : memref<1x128xf32, #tpu.memory_space<vmem>>, vector<1x128xf32>
    %15 = vector.broadcast %14 : vector<1x128xf32> to vector<8x128xf32>
    %16 = arith.mulf %15, %13 : vector<8x128xf32>
    %c0_9 = arith.constant 0 : index
    %c0_10 = arith.constant 0 : index
    %17 = vector.load %arg3[%c0_9, %c0_10] : memref<1x128xf32, #tpu.memory_space<vmem>>, vector<1x128xf32>
    %18 = vector.broadcast %17 : vector<1x128xf32> to vector<8x128xf32>
    %19 = arith.addf %16, %18 : vector<8x128xf32>
    %c0_11 = arith.constant 0 : index
    %c0_12 = arith.constant 0 : index
    %20 = vector.load %arg5[%c0_11, %c0_12] : memref<8x128xf32, #tpu.memory_space<vmem>>, vector<8x128xf32>
    tpu.vector_store %arg5[%c0_11, %c0_12], %19 {strides = array<i32>} : memref<8x128xf32, #tpu.memory_space<vmem>>, vector<8x128xf32>,
    return
  }
  func.func @transform_0(%arg0: i32) -> (i32, i32) {
    %c0_i32 = arith.constant 0 : i32
    %c0_i32_0 = arith.constant 0 : i32
    return %arg0, %c0_i32 : i32, i32
  }
  func.func @transform_1(%arg0: i32) -> (i32, i32) {
    %c0_i32 = arith.constant 0 : i32
    %c0_i32_0 = arith.constant 0 : i32
    %c0_i32_1 = arith.constant 0 : i32
    return %c0_i32, %c0_i32_0 : i32, i32
  }
  func.func @transform_2(%arg0: i32) -> (i32, i32) {
    %c0_i32 = arith.constant 0 : i32
    %c0_i32_0 = arith.constant 0 : i32
    %c0_i32_1 = arith.constant 0 : i32
    return %c0_i32, %c0_i32_0 : i32, i32
  }
  func.func @transform_3(%arg0: i32) -> (i32, i32) {
    %c0_i32 = arith.constant 0 : i32
    %c0_i32_0 = arith.constant 0 : i32
    %c0_i32_1 = arith.constant 0 : i32
    return %c0_i32, %c0_i32_0 : i32, i32
  }
  func.func @transform_4(%arg0: i32) -> (i32, i32) {
    %c0_i32 = arith.constant 0 : i32
    %c0_i32_0 = arith.constant 0 : i32
    return %arg0, %c0_i32 : i32, i32
  }
}

</mosaic_0001>

<bundles_post_ra>
// kernel: tpu_custom_call.1
= control target key start
LH: loop header
LB: loop body
LE: loop exit
PB: predicated region body
PF: predicated region fallthrough
CT: control target
= control target key end

     0   :  { %9 = vsyncpa [#allocation3], 0  ;;  %s1372_s0 = inlined_call_operand.hbm [shape: f32[4,128], index: 0, kind: input, shape index: {}]   ;;  %s1373_s1 = inlined_call_operand.hbm [shape: f32[1,128], index: 1, kind: input, shape index: {}]   ;;  %s1374_s2 = inlined_call_operand.vmem [shape: f32[1,128], index: 2, kind: input, shape index: {}]   ;;  %s1375_s3 = inlined_call_operand.hbm [shape: f32[128,128], index: 3, kind: input, shape index: {}]   ;;  %s1376_s4 = inlined_call_operand.hbm [shape: f32[4,128], index: 4, kind: output, shape index: {}]  }
   0x1   :  { %10 = vsyncpa [#allocation6], 0 }
   0x2   :  { %11 = vsyncpa [#allocation4], 0  ;;  %s30_s17 = sshll.u32 %s1373_s1, 4  ;;  %s31_s17 = int_to_ptr.hbm [resolvable:$true] %s30_s17 }
   0x3   :  { %15 = vsyncadd [#allocation3], 64  ;;  %s923_s18 = smov [#allocation5]   ;;  %s16_s22 = sshll.u32 %s1372_s0, 4  ;;  %s17_s22 = int_to_ptr.hbm [resolvable:$true] %s16_s22 }
   0x4   :  { %s32_s19 = sshll.u32 %s923_s18, 4  ;;  %s924_s23 = smov [#allocation2]   ;;  %s33_s19 = int_to_ptr.vmem [resolvable:$true] %s32_s19 }
   0x5   :  { %35 = dma.hbm_to_vmem [thread:$0]  %s31_s17, 16, %s33_s19, [#allocation6]  }
   0x6   :  { %s18_s24 = sshll.u32 %s924_s23, 4  ;;  %s925_s25 = smov 64   ;;  %s19_s24 = int_to_ptr.vmem [resolvable:$true] %s18_s24 }
   0x7   :  { %s926_s26 = smov 4   ;;  %s42_s28 = sshll.u32 %s1375_s3, 4  ;;  %s43_s28 = int_to_ptr.hbm [resolvable:$true] %s42_s28 }
   0x8   :  { %24 = dma.hbm_to_vmem [thread:$0]  %s17_s22, 64, %s19_s24, [#allocation3], %s925_s25, %s925_s25, %s926_s26  }
   0x9   :  { %s927_s29 = smov [#allocation7]   ;;  %s928_s0 = smov 128  }
   0xa   :  { %s44_s30 = sshll.u32 %s927_s29, 4  ;;  %s929_s5 = smov 8   ;;  %s45_s30 = int_to_ptr.vmem [resolvable:$true] %s44_s30 }
   0xb   :  { %50 = dma.hbm_to_vmem [thread:$0]  %s43_s28, 2048, %s45_s30, [#allocation6], %s928_s0, %s928_s0, %s929_s5  }
   0xc   :  { %917 = dma.done.wait [#allocation3], 128  }
   0xd   :  { %918 = vsyncadd [#allocation3], 4294967168 }
   0xe   :  { %919 = dma.done.wait [#allocation6], 2064  }
   0xf   :  { %920 = vsyncadd [#allocation6], 4294965232  ;;  %v79_v0 = vld [vmem:[#allocation7 + $0x78] sm:$0xff]  ;;  %v78_v1 = vld [vmem:[#allocation7 + $0x70] sm:$0xff] }
  0x10   :  { %v77_v2 = vld [vmem:[#allocation7 + $0x68] sm:$0xff]  ;;  %v968_v3 = vand.u32 4294901760, %v79_v0  ;;  %v970_v4 = vand.u32 4294901760, %v78_v1  ;;  %v76_v6 = vld [vmem:[#allocation7 + $0x60] sm:$0xff]  ;;  %v75_v7 = vld [vmem:[#allocation7 + $0x58] sm:$0xff] }
  0x11   :  { %v972_v5 = vand.u32 4294901760, %v77_v2  ;;  %v74_v8 = vld [vmem:[#allocation7 + $0x50] sm:$0xff]  ;;  %v974_v9 = vand.u32 4294901760, %v76_v6  ;;  %v976_v10 = vand.u32 4294901760, %v75_v7  ;;  %v73_v12 = vld [vmem:[#allocation7 + $0x48] sm:$0xff]  ;;  %v72_v13 = vld [vmem:[#allocation7 + $0x40] sm:$0xff] }
  0x12   :  { %v978_v11 = vand.u32 4294901760, %v74_v8  ;;  %81 = vmatpush.msra.mxu0 %v968_v3  ;;  %v982_v14 = vsub.f32 %v79_v0, %v968_v3  ;;  %v985_v15 = vsub.f32 %v78_v1, %v970_v4  ;;  %v990_v17 = vand.u32 4294901760, %v73_v12  ;;  %v71_v18 = vld [vmem:[#allocation7 + $0x38] sm:$0xff]  ;;  %277 = vmatpush.msra.mxu3 %v968_v3  ;;  %v70_v26 = vld [vmem:[#allocation7 + $0x30] sm:$0xff]  ;;  %v69_v36 = vld [vmem:[#allocation7 + $0x28] sm:$0xff] }
  0x13   :  { %v988_v16 = vsub.f32 %v77_v2, %v972_v5  ;;  %v994_v19 = vsub.f32 %v76_v6, %v974_v9  ;;  %v997_v20 = vsub.f32 %v75_v7, %v976_v10  ;;  %v1012_v25 = vand.u32 4294901760, %v72_v13  ;;  %v68_v42 = vld [vmem:[#allocation7 + $0x20] sm:$0xff]  ;;  %v67_v47 = vld [vmem:[#allocation7 + $0x18] sm:$0xff]  ;;  %v66_v55 = vld [vmem:[#allocation7 + $0x10] sm:$0xff] }
  0x14   :  { %v1000_v21 = vsub.f32 %v74_v8, %v978_v11  ;;  %83 = vmatpush.msra.mxu0 %v970_v4  ;;  %v1004_v22 = vand.u32 4294901760, %v982_v14  ;;  %v1007_v23 = vand.u32 4294901760, %v985_v15  ;;  %224 = vmatpush.msra.mxu2 %v982_v14  ;;  %v1018_v28 = vand.u32 4294901760, %v71_v18  ;;  %v65_v60 = vld [vmem:[#allocation7 + $0x8] sm:$0xff]  ;;  %v64_v1 = vld [vmem:[#allocation7] sm:$0xff]  ;;  %v1122_v7 = vld [vmem:[#allocation2] sm:$0xff] }
  0x15   :  { %v1010_v24 = vand.u32 4294901760, %v988_v16  ;;  %v1016_v27 = vand.u32 4294901760, %v994_v19  ;;  %v1021_v29 = vsub.f32 %v73_v12, %v990_v17  ;;  %279 = vmatpush.msra.mxu3 %v970_v4  ;;  %v1032_v33 = vand.u32 4294901760, %v997_v20  ;;  %1391 = vst [vmem:[#allocation18_spill] sm:$0xff] %v1122_v7 }
  0x16   :  { %85 = vmatpush.msra.mxu0 %v972_v5  ;;  %v124_v30 = vsub.f32 %v982_v14, %v1004_v22  ;;  %v130_v31 = vsub.f32 %v985_v15, %v1007_v23  ;;  %227 = vmatpush.msra.mxu2 %v985_v15  ;;  %v1036_v34 = vand.u32 4294901760, %v1000_v21  ;;  %v1038_v35 = vand.u32 4294901760, %v70_v26 }
  0x17   :  { %v136_v32 = vsub.f32 %v988_v16, %v1010_v24  ;;  %281 = vmatpush.msra.mxu3 %v972_v5  ;;  %v142_v39 = vsub.f32 %v994_v19, %v1016_v27  ;;  %v1049_v40 = vsub.f32 %v72_v13, %v1012_v25  ;;  %v1053_v41 = vand.u32 4294901760, %v1021_v29 }
  0x18   :  { %v1041_v37 = vand.u32 4294901760, %v124_v30  ;;  %87 = vmatpush.msra.mxu0 %v974_v9  ;;  %v1044_v38 = vand.u32 4294901760, %v130_v31  ;;  %230 = vmatpush.msra.mxu2 %v988_v16  ;;  %v148_v44 = vsub.f32 %v997_v20, %v1032_v33  ;;  %v1062_v45 = vand.u32 4294901760, %v69_v36 }
  0x19   :  { %1385 = vst [vmem:[#allocation12_spill] sm:$0xff] %v1049_v40  ;;  %283 = vmatpush.msra.mxu3 %v974_v9  ;;  %v1058_v43 = vand.u32 4294901760, %v136_v32  ;;  %v1065_v46 = vsub.f32 %v71_v18, %v1018_v28  ;;  %v154_v48 = vsub.f32 %v1000_v21, %v1036_v34  ;;  %v1073_v49 = vand.u32 4294901760, %v142_v39 }
  0x1a   :  { %126 = vmatpush.msra.mxu1 %v1041_v37  ;;  %89 = vmatpush.msra.mxu0 %v976_v10  ;;  %v1076_v50 = vand.u32 4294901760, %v1049_v40  ;;  %v1078_v51 = vand.u32 4294901760, %v68_v42  ;;  %v1081_v52 = vsub.f32 %v70_v26, %v1038_v35  ;;  %v160_v53 = vsub.f32 %v1021_v29, %v1053_v41 }
  0x1b   :  { %1386 = vst [vmem:[#allocation13_spill] sm:$0xff] %v1065_v46  ;;  %233 = vmatpush.msra.mxu2 %v994_v19  ;;  %285 = vmatpush.msra.mxu3 %v976_v10  ;;  %v1085_v54 = vand.u32 4294901760, %v67_v47  ;;  %v1091_v56 = vand.u32 4294901760, %v148_v44  ;;  %v1094_v57 = vand.u32 4294901760, %v1065_v46  ;;  %v1097_v58 = vsub.f32 %v69_v36, %v1062_v45 }
  0x1c   :  { %132 = vmatpush.msra.mxu1 %v1044_v38  ;;  %91 = vmatpush.msra.mxu0 %v978_v11  ;;  %1387 = vst [vmem:[#allocation14_spill] sm:$0xff] %v1081_v52  ;;  %v1099_v59 = vand.u32 4294901760, %v154_v48  ;;  %v166_v61 = vsub.f32 %v1049_v40, %v1076_v50  ;;  %v1108_v62 = vand.u32 4294901760, %v1081_v52  ;;  %v1110_v63 = vand.u32 4294901760, %v66_v55 }
  0x1d   :  { %236 = vmatpush.msra.mxu2 %v997_v20  ;;  %287 = vmatpush.msra.mxu3 %v978_v11  ;;  %1388 = vst [vmem:[#allocation15_spill] sm:$0xff] %v1097_v58  ;;  %v1113_v0 = vsub.f32 %v68_v42, %v1078_v51  ;;  %v1115_v2 = vand.u32 4294901760, %v160_v53  ;;  %v1118_v6 = vsub.f32 %v67_v47, %v1085_v54  ;;  %v1129_v12 = vand.u32 4294901760, %v1097_v58 }
  0x1e   :  { %138 = vmatpush.msra.mxu1 %v1058_v43  ;;  %93 = vmatpush.msra.mxu0 %v990_v17  ;;  %v172_v8 = vsub.f32 %v1065_v46, %v1094_v57  ;;  %v1131_v13 = vand.u32 4294901760, %v65_v60  ;;  %v1134_v18 = vand.u32 4294901760, %v1122_v7  ;;  %v1136_v26 = vand.u32 4294901760, %v64_v1 }
  0x1f   :  { %239 = vmatpush.msra.mxu2 %v1000_v21  ;;  %289 = vmatpush.msra.mxu3 %v990_v17  ;;  %1389 = vst [vmem:[#allocation16_spill] sm:$0xff] %v1113_v0  ;;  %v1142_v30 = vand.u32 4294901760, %v166_v61  ;;  %v178_v31 = vsub.f32 %v1081_v52, %v1108_v62  ;;  %v1147_v32 = vand.u32 4294901760, %v1113_v0  ;;  %v1150_v36 = vsub.f32 %v66_v55, %v1110_v63 }
  0x20   :  { %144 = vmatpush.msra.mxu1 %v1073_v49  ;;  %95 = vmatpush.msra.mxu0 %v1012_v25  ;;  %1390 = vst [vmem:[#allocation17_spill] sm:$0xff] %v1118_v6  ;;  %v1153_v39 = vand.u32 4294901760, %v1118_v6  ;;  %v1159_v42 = vand.u32 4294901760, %v172_v8  ;;  %v184_v44 = vsub.f32 %v1097_v58, %v1129_v12  ;;  %v1164_v47 = vsub.f32 %v65_v60, %v1131_v13 }
  0x21   :  { %242 = vmatpush.msra.mxu2 %v1021_v29  ;;  %291 = vmatpush.msra.mxu3 %v1012_v25  ;;  %1392 = vst [vmem:[#allocation19_spill] sm:$0xff] %v1150_v36  ;;  %v113_v48 = vsub.f32 %v1122_v7, %v1134_v18  ;;  %v1172_v53 = vand.u32 4294901760, %v178_v31  ;;  %v190_v55 = vsub.f32 %v1113_v0, %v1147_v32  ;;  %v1177_v61 = vand.u32 4294901760, %v1150_v36 }
  0x22   :  { %150 = vmatpush.msra.mxu1 %v1091_v56  ;;  %97 = vmatpush.msra.mxu0 %v1018_v28  ;;  %v1180_v60 = vsub.f32 %v64_v1, %v1136_v26  ;;  %v1186_v8 = vand.u32 4294901760, %v184_v44  ;;  %v196_v31 = vsub.f32 %v1118_v6, %v1153_v39  ;;  %v1191_v7 = vand.u32 4294901760, %v1164_v47 }
  0x23   :  { %245 = vmatpush.msra.mxu2 %v1049_v40  ;;  %293 = vmatpush.msra.mxu3 %v1018_v28  ;;  %v1197_v1 = vand.u32 4294901760, %v190_v55  ;;  %v202_v44 = vsub.f32 %v1150_v36, %v1177_v61 }
  0x24   :  { %156 = vmatpush.msra.mxu1 %v1099_v59  ;;  %99 = vmatpush.msra.mxu0 %v1038_v35  ;;  %v208_v55 = vsub.f32 %v1164_v47, %v1191_v7 }
  0x25   :  { %248 = vmatpush.msra.mxu2 %v1065_v46  ;;  %295 = vmatpush.msra.mxu3 %v1038_v35 }
  0x26   :  { %162 = vmatpush.msra.mxu1 %v1115_v2  ;;  %101 = vmatpush.msra.mxu0 %v1062_v45 }
  0x27   :  { %251 = vmatpush.msra.mxu2 %v1081_v52  ;;  %297 = vmatpush.msra.mxu3 %v1062_v45  ;;  %v114_v52 = vand.u32 4294901760, %v113_v48 }
  0x28   :  { %168 = vmatpush.msra.mxu1 %v1142_v30  ;;  %103 = vmatpush.msra.mxu0 %v1078_v51 }
  0x29   :  { %254 = vmatpush.msra.mxu2 %v1097_v58  ;;  %299 = vmatpush.msra.mxu3 %v1078_v51  ;;  %v1202_v58 = vand.u32 4294901760, %v1180_v60  ;;  %v115_v46 = vsub.f32 %v113_v48, %v114_v52 }
  0x2a   :  { %174 = vmatpush.msra.mxu1 %v1159_v42  ;;  %105 = vmatpush.msra.mxu0 %v1085_v54 }
  0x2b   :  { %257 = vmatpush.msra.mxu2 %v1113_v0  ;;  %301 = vmatpush.msra.mxu3 %v1085_v54  ;;  %v1208_v0 = vand.u32 4294901760, %v196_v31  ;;  %v214_v40 = vsub.f32 %v1180_v60, %v1202_v58  ;;  %v1223_v31 = vand.u32 4294901760, %v208_v55 }
  0x2c   :  { %180 = vmatpush.msra.mxu1 %v1172_v53  ;;  %107 = vmatpush.msra.mxu0 %v1110_v63 }
  0x2d   :  { %260 = vmatpush.msra.mxu2 %v1118_v6  ;;  %303 = vmatpush.msra.mxu3 %v1110_v63  ;;  %v1216_v6 = vand.u32 4294901760, %v202_v44  ;;  %v1229_v44 = vand.u32 4294901760, %v214_v40 }
  0x2e   :  { %186 = vmatpush.msra.mxu1 %v1186_v8  ;;  %109 = vmatpush.msra.mxu0 %v1131_v13 }
  0x2f   :  { %263 = vmatpush.msra.mxu2 %v1150_v36  ;;  %305 = vmatpush.msra.mxu3 %v1131_v13  ;;  %v116_v36 = vand.u32 4294901760, %v115_v46 }
  0x30   :  { %192 = vmatpush.msra.mxu1 %v1197_v1  ;;  %111 = vmatpush.msra.mxu0 %v1136_v26 }
  0x31   :  { %266 = vmatpush.msra.mxu2 %v1164_v47  ;;  %307 = vmatpush.msra.mxu3 %v1136_v26 }
  0x32   :  { %318 = vmatpush.msrb.mxu0 %v1004_v22  ;;  %198 = vmatpush.msra.mxu1 %v1208_v0 }
  0x33   :  { %269 = vmatpush.msra.mxu2 %v1180_v60  ;;  %311 = vmatmul.f32.vlgmr.msra.gmra.mxu3 %v114_v52 }
  0x34   :  { %322 = vmatpush.msrb.mxu0 %v1007_v23  ;;  %204 = vmatpush.msra.mxu1 %v1216_v6 }
  0x35   :  { %272 = vmatmul.f32.vlgmr.msra.gmra.mxu2 %v113_v48  ;;  %117 = vmatmul.f32.vlgmr.msra.gmra.mxu0 %v116_v36 }
  0x36   :  { %326 = vmatpush.msrb.mxu0 %v1010_v24  ;;  %210 = vmatpush.msra.mxu1 %v1223_v31 }
  0x37   :  { %470 = vmatpush.msrb.mxu3 %v1041_v37  ;;  %425 = vmatpush.msrb.mxu2 %v968_v3 }
  0x38   :  { %330 = vmatpush.msrb.mxu0 %v1016_v27  ;;  %216 = vmatpush.msra.mxu1 %v1229_v44 }
  0x39   :  { %218 = vmatmul.f32.vlgmr.msra.gmra.mxu1 %v1134_v18  ;;  %476 = vmatpush.msrb.mxu3 %v1044_v38 }
  0x3a   :  { %385 = vmatpush.msrb.mxu1 %v968_v3  ;;  %334 = vmatpush.msrb.mxu0 %v1032_v33 }
  0x3b   :  { %482 = vmatpush.msrb.mxu3 %v1058_v43  ;;  %427 = vmatpush.msrb.mxu2 %v970_v4 }
  0x3c   :  { %387 = vmatpush.msrb.mxu1 %v970_v4  ;;  %338 = vmatpush.msrb.mxu0 %v1036_v34 }
  0x3d   :  { %488 = vmatpush.msrb.mxu3 %v1073_v49  ;;  %429 = vmatpush.msrb.mxu2 %v972_v5 }
  0x3e   :  { %389 = vmatpush.msrb.mxu1 %v972_v5  ;;  %342 = vmatpush.msrb.mxu0 %v1053_v41 }
  0x3f   :  { %494 = vmatpush.msrb.mxu3 %v1091_v56  ;;  %431 = vmatpush.msrb.mxu2 %v974_v9 }
  0x40   :  { %391 = vmatpush.msrb.mxu1 %v974_v9  ;;  %346 = vmatpush.msrb.mxu0 %v1076_v50 }
  0x41   :  { %500 = vmatpush.msrb.mxu3 %v1099_v59  ;;  %433 = vmatpush.msrb.mxu2 %v976_v10 }
  0x42   :  { %393 = vmatpush.msrb.mxu1 %v976_v10  ;;  %350 = vmatpush.msrb.mxu0 %v1094_v57 }
  0x43   :  { %506 = vmatpush.msrb.mxu3 %v1115_v2  ;;  %435 = vmatpush.msrb.mxu2 %v978_v11 }
  0x44   :  { %395 = vmatpush.msrb.mxu1 %v978_v11  ;;  %354 = vmatpush.msrb.mxu0 %v1108_v62 }
  0x45   :  { %512 = vmatpush.msrb.mxu3 %v1142_v30  ;;  %437 = vmatpush.msrb.mxu2 %v990_v17  ;;  %v818_v30 = vld [vmem:[%s1374_s2] ss:$0 sm:$0xff] }
  0x46   :  { %397 = vmatpush.msrb.mxu1 %v990_v17  ;;  %358 = vmatpush.msrb.mxu0 %v1129_v12 }
  0x47   :  { %518 = vmatpush.msrb.mxu3 %v1159_v42  ;;  %439 = vmatpush.msrb.mxu2 %v1012_v25 }
  0x48   :  { %399 = vmatpush.msrb.mxu1 %v1012_v25  ;;  %362 = vmatpush.msrb.mxu0 %v1147_v32 }
  0x49   :  { %524 = vmatpush.msrb.mxu3 %v1172_v53  ;;  %441 = vmatpush.msrb.mxu2 %v1018_v28 }
  0x4a   :  { %401 = vmatpush.msrb.mxu1 %v1018_v28  ;;  %366 = vmatpush.msrb.mxu0 %v1153_v39 }
  0x4b   :  { %530 = vmatpush.msrb.mxu3 %v1186_v8  ;;  %443 = vmatpush.msrb.mxu2 %v1038_v35 }
  0x4c   :  { %403 = vmatpush.msrb.mxu1 %v1038_v35  ;;  %370 = vmatpush.msrb.mxu0 %v1177_v61 }
  0x4d   :  { %536 = vmatpush.msrb.mxu3 %v1197_v1  ;;  %445 = vmatpush.msrb.mxu2 %v1062_v45 }
  0x4e   :  { %405 = vmatpush.msrb.mxu1 %v1062_v45  ;;  %374 = vmatpush.msrb.mxu0 %v1191_v7 }
  0x4f   :  { %542 = vmatpush.msrb.mxu3 %v1208_v0  ;;  %447 = vmatpush.msrb.mxu2 %v1078_v51 }
  0x50   :  { %407 = vmatpush.msrb.mxu1 %v1078_v51  ;;  %378 = vmatpush.msrb.mxu0 %v1202_v58 }
  0x51   :  { %380 = vmatmul.f32.vlgmr.msrb.gmra.mxu0 %v1134_v18  ;;  %548 = vmatpush.msrb.mxu3 %v1216_v6 }
  0x52   :  { %409 = vmatpush.msrb.mxu1 %v1085_v54  ;;  %568 = vmatpush.msra.mxu0 %v982_v14  ;;  %v1399_v14 = vld [vmem:[#allocation19_spill] sm:$0xff] }
  0x53   :  { %554 = vmatpush.msrb.mxu3 %v1223_v31  ;;  %449 = vmatpush.msrb.mxu2 %v1085_v54 }
  0x54   :  { %411 = vmatpush.msrb.mxu1 %v1110_v63  ;;  %571 = vmatpush.msra.mxu0 %v985_v15 }
  0x55   :  { %560 = vmatpush.msrb.mxu3 %v1229_v44  ;;  %451 = vmatpush.msrb.mxu2 %v1110_v63 }
  0x56   :  { %413 = vmatpush.msrb.mxu1 %v1131_v13  ;;  %574 = vmatpush.msra.mxu0 %v988_v16 }
  0x57   :  { %729 = vmatpush.msra.mxu3 %v968_v3  ;;  %453 = vmatpush.msrb.mxu2 %v1131_v13 }
  0x58   :  { %415 = vmatpush.msrb.mxu1 %v1136_v26  ;;  %577 = vmatpush.msra.mxu0 %v994_v19 }
  0x59   :  { %417 = vmatmul.f32.vlgmr.msrb.gmra.mxu1 %v1134_v18  ;;  %731 = vmatpush.msra.mxu3 %v970_v4 }
  0x5a   :  { %621 = vmatpush.msra.mxu1 %v968_v3  ;;  %580 = vmatpush.msra.mxu0 %v997_v20  ;;  %v1393_v3 = vld [vmem:[#allocation12_spill] sm:$0xff] }
  0x5b   :  { %733 = vmatpush.msra.mxu3 %v972_v5  ;;  %455 = vmatpush.msrb.mxu2 %v1136_v26 }
  0x5c   :  { %623 = vmatpush.msra.mxu1 %v970_v4  ;;  %583 = vmatpush.msra.mxu0 %v1000_v21  ;;  %v1394_v4 = vld [vmem:[#allocation13_spill] sm:$0xff] }
  0x5d   :  { %735 = vmatpush.msra.mxu3 %v974_v9  ;;  %662 = vmatpush.msra.mxu2 %v1004_v22 }
  0x5e   :  { %625 = vmatpush.msra.mxu1 %v972_v5  ;;  %586 = vmatpush.msra.mxu0 %v1021_v29  ;;  %v1395_v5 = vld [vmem:[#allocation14_spill] sm:$0xff] }
  0x5f   :  { %737 = vmatpush.msra.mxu3 %v976_v10  ;;  %666 = vmatpush.msra.mxu2 %v1007_v23  ;;  %v1400_v29 = vld [vmem:[#allocation18_spill] sm:$0xff] }
  0x60   :  { %627 = vmatpush.msra.mxu1 %v974_v9  ;;  %589 = vmatpush.msra.mxu0 %v1393_v3  ;;  %v1396_v9 = vld [vmem:[#allocation15_spill] sm:$0xff] }
  0x61   :  { %739 = vmatpush.msra.mxu3 %v978_v11  ;;  %670 = vmatpush.msra.mxu2 %v1010_v24 }
  0x62   :  { %629 = vmatpush.msra.mxu1 %v976_v10  ;;  %592 = vmatpush.msra.mxu0 %v1394_v4  ;;  %v1397_v10 = vld [vmem:[#allocation16_spill] sm:$0xff] }
  0x63   :  { %741 = vmatpush.msra.mxu3 %v990_v17  ;;  %674 = vmatpush.msra.mxu2 %v1016_v27 }
  0x64   :  { %631 = vmatpush.msra.mxu1 %v978_v11  ;;  %595 = vmatpush.msra.mxu0 %v1395_v5  ;;  %v1398_v11 = vld [vmem:[#allocation17_spill] sm:$0xff] }
  0x65   :  { %743 = vmatpush.msra.mxu3 %v1012_v25  ;;  %678 = vmatpush.msra.mxu2 %v1032_v33 }
  0x66   :  { %633 = vmatpush.msra.mxu1 %v990_v17  ;;  %598 = vmatpush.msra.mxu0 %v1396_v9 }
  0x67   :  { %745 = vmatpush.msra.mxu3 %v1018_v28  ;;  %682 = vmatpush.msra.mxu2 %v1036_v34 }
  0x68   :  { %635 = vmatpush.msra.mxu1 %v1012_v25  ;;  %601 = vmatpush.msra.mxu0 %v1397_v10 }
  0x69   :  { %747 = vmatpush.msra.mxu3 %v1038_v35  ;;  %686 = vmatpush.msra.mxu2 %v1053_v41 }
  0x6a   :  { %637 = vmatpush.msra.mxu1 %v1018_v28  ;;  %604 = vmatpush.msra.mxu0 %v1398_v11 }
  0x6b   :  { %749 = vmatpush.msra.mxu3 %v1062_v45  ;;  %690 = vmatpush.msra.mxu2 %v1076_v50 }
  0x6c   :  { %639 = vmatpush.msra.mxu1 %v1038_v35  ;;  %607 = vmatpush.msra.mxu0 %v1399_v14 }
  0x6d   :  { %751 = vmatpush.msra.mxu3 %v1078_v51  ;;  %694 = vmatpush.msra.mxu2 %v1094_v57 }
  0x6e   :  { %641 = vmatpush.msra.mxu1 %v1062_v45  ;;  %610 = vmatpush.msra.mxu0 %v1164_v47 }
  0x6f   :  { %753 = vmatpush.msra.mxu3 %v1085_v54  ;;  %698 = vmatpush.msra.mxu2 %v1108_v62 }
  0x70   :  { %643 = vmatpush.msra.mxu1 %v1078_v51  ;;  %613 = vmatpush.msra.mxu0 %v1180_v60 }
  0x71   :  { %755 = vmatpush.msra.mxu3 %v1110_v63  ;;  %702 = vmatpush.msra.mxu2 %v1129_v12 }
  0x72   :  { %645 = vmatpush.msra.mxu1 %v1085_v54 }
  0x73   :  { %757 = vmatpush.msra.mxu3 %v1131_v13  ;;  %706 = vmatpush.msra.mxu2 %v1147_v32 }
  0x74   :  { %647 = vmatpush.msra.mxu1 %v1110_v63 }
  0x75   :  { %759 = vmatpush.msra.mxu3 %v1136_v26  ;;  %710 = vmatpush.msra.mxu2 %v1153_v39 }
  0x76   :  { %649 = vmatpush.msra.mxu1 %v1131_v13  ;;  %v817_v13 = vld [vmem:[#allocation5] ss:$0 sm:$0xff] }
  0x77   :  { %714 = vmatpush.msra.mxu2 %v1177_v61 }
  0x78   :  { %651 = vmatpush.msra.mxu1 %v1136_v26 }
  0x79   :  { %718 = vmatpush.msra.mxu2 %v1191_v7 }
  0x7b   :  { %722 = vmatpush.msra.mxu2 %v1202_v58 }
  0xb2   :  { %v118_v16 = vpop.f32.mrf.mxu0 }
  0xb6   :  { %v219_v15 = vpop.f32.mrf.mxu1  ;;  %v312_v21 = vpop.f32.mrf.mxu3 }
  0xb7   :  { %v220_v17 = vadd.f32 %v219_v15, %v118_v16 }
  0xb8   :  { %v273_v19 = vpop.f32.mrf.mxu2 }
  0xb9   :  { %v274_v20 = vadd.f32 %v273_v19, %v220_v17 }
  0xbb   :  { %v313_v22 = vadd.f32 %v312_v21, %v274_v20 }
  0xce   :  { %v381_v23 = vpop.f32.mrf.mxu0 }
  0xcf   :  { %v382_v24 = vadd.f32 %v381_v23, %v313_v22 }
  0xd6   :  { %v418_v25 = vpop.f32.mrf.mxu1 }
  0xd7   :  { %v419_v27 = vadd.f32 %v418_v25, %v382_v24 }
  0xd9   :  { %v421_v28 = vmul.f32 0.03125, %v419_v27 }
  0xdb   :  { %v422_v33 = vsub.f32 %v1400_v29, %v421_v28 }
  0xdd   :  { %v423_v34 = vmul.f32 %v422_v33, %v422_v33 }
  0xdf   :  { %v456_v35 = vand.u32 4294901760, %v423_v34 }
  0xe1   :  { %v457_v37 = vsub.f32 %v423_v34, %v456_v35  ;;  %562 = vmatmul.f32.vlgmr.msrb.gmra.mxu3 %v456_v35 }
  0xe3   :  { %616 = vmatmul.f32.vlgmr.msra.gmra.mxu0 %v457_v37  ;;  %v458_v38 = vand.u32 4294901760, %v457_v37 }
  0xe5   :  { %655 = vmatmul.f32.vlgmr.msra.gmra.mxu1 %v458_v38  ;;  %v459_v40 = vsub.f32 %v457_v37, %v458_v38 }
  0xe7   :  { %v460_v41 = vand.u32 4294901760, %v459_v40 }
  0xe9   :  { %461 = vmatmul.f32.vlgmr.msrb.gmra.mxu2 %v460_v41  ;;  %761 = vmatmul.f32.vlgmr.msra.gmra.mxu3 %v456_v35 }
  0xf1   :  { %724 = vmatmul.f32.vlgmr.msra.gmra.mxu2 %v456_v35 }
 0x160   :  { %v617_v49 = vpop.f32.mrf.mxu0 }
 0x162   :  { %v656_v51 = vpop.f32.mrf.mxu1 }
 0x164   :  { %v563_v43 = vpop.f32.mrf.mxu3 }
 0x16c   :  { %v462_v45 = vpop.f32.mrf.mxu2  ;;  %v762_v57 = vpop.f32.mrf.mxu3 }
 0x16d   :  { %v564_v46 = vadd.f32 %v563_v43, %v462_v45 }
 0x16f   :  { %v618_v50 = vadd.f32 %v617_v49, %v564_v46 }
 0x171   :  { %v657_v52 = vadd.f32 %v656_v51, %v618_v50 }
 0x174   :  { %v725_v54 = vpop.f32.mrf.mxu2 }
 0x175   :  { %v726_v56 = vadd.f32 %v725_v54, %v657_v52 }
 0x177   :  { %v763_v58 = vadd.f32 %v762_v57, %v726_v56 }
 0x179   :  { %v765_v59 = vmul.f32 0.03125, %v763_v58 }
 0x17b   :  { %v766_v62 = vadd.f32 1e-12, %v765_v59 }
 0x17d   :  { %819 = vrsqrt.f32 %v766_v62  ;;  %vm773_vm1 = vweird.f32 %v766_v62 }
 0x183   :  { %v820_v63 = vpop.eup %819 }
 0x184   :  { %v768_v0 = vmul.f32 %v820_v63, %v766_v62  ;;  %vm774_vm0 = vweird.f32 %v820_v63 }
 0x185   :  { %vm775_vm2 = vmor %vm773_vm1, %vm774_vm0 }
 0x186   :  { %v769_v2 = vmul.f32 %v820_v63, %v768_v0 }
 0x188   :  { %v770_v6 = vmul.f32 0.5, %v769_v2 }
 0x18a   :  { %v771_v7 = vsub.f32 1.5, %v770_v6 }
 0x18c   :  { %v772_v12 = vmul.f32 %v820_v63, %v771_v7 }
 0x18e   :  { %v776_v18 = vsel %vm775_vm2, %v820_v63, %v772_v12 }
 0x18f   :  { %v777_v26 = vmul.f32 %v776_v18, %v422_v33 }
 0x191   :  { %v782_v32 = vmul.f32 %v817_v13, %v777_v26 }
 0x193   :  { %v787_v36 = vadd.f32 %v818_v30, %v782_v32 }
 0x195   :  { %788 = vst [vmem:[#allocation8] sm:$0xff] %v787_v36 }
 0x196   :  { %792 = vsyncadd [#allocation4], 64  ;;  %s795_s9 = sshll.u32 %s1376_s4, 4  ;;  %s930_s10 = smov [#allocation8]   ;;  %s796_s9 = int_to_ptr.hbm [resolvable:$true] %s795_s9 }
 0x197   :  { %s793_s11 = sshll.u32 %s930_s10, 4  ;;  %s794_s11 = int_to_ptr.vmem [resolvable:$true] %s793_s11 }
 0x198   :  { %801 = dma.vmem_to_hbm [thread:$0]  %s794_s11, 64, %s796_s9, [#allocation4], %s925_s25, %s925_s25, %s926_s26  }
 0x199   :  { %921 = dma.done.wait [#allocation4], 128  }
 0x19a   :  { %922 = vsyncadd [#allocation4], 4294967168 }
 0x19b   :  { %806 = vsyncpa [#allocation3], 1 }
 0x19c   :  { %807 = vsyncpa [#allocation6], 1 }
 0x19d   :  { %808 = vsyncpa [#allocation4], 1 }

</bundles_post_ra>
